<compile_context>
chip_gen: v6e
topology: v6e:2x2x1
jax: 0.10.0
libtpu: 0.0.40
codegen_flags: <defaults>
</compile_context>

<pallas_src>
import functools

import jax
import jax.numpy as jnp
from jax.experimental import pallas as pl
from jax.experimental.pallas import tpu as pltpu


def dec_kernel(x_ref, w1_ref, b1_ref, w2_ref, b2_ref, w3_ref, b3_ref,
               o_ref, h_ref):
    # fc1 + LeakyReLU(0.2): bf16 operands into the MXU, f32 accumulation.
    h = jnp.dot(x_ref[...].astype(jnp.bfloat16), w1_ref[...],
                preferred_element_type=jnp.float32)
    h = h + b1_ref[...]
    h_ref[...] = jnp.where(h > 0, h, 0.2 * h)

    # fc2 + LeakyReLU(0.2)
    h = jnp.dot(h_ref[...].astype(jnp.bfloat16), w2_ref[...],
                preferred_element_type=jnp.float32)
    h = h + b2_ref[...]
    h_ref[...] = jnp.where(h > 0, h, 0.2 * h)

    # fc3 (no activation)
    h = jnp.dot(h_ref[...].astype(jnp.bfloat16), w3_ref[...],
                preferred_element_type=jnp.float32)
    o_ref[...] = (h + b3_ref[...]).astype(o_ref.dtype)


@functools.partial(jax.jit, static_argnames=("tile_m",))
def dec_forward(feat, params, *, tile_m=8):
    """feat: [B, resSize] f32. Returns [B, attSize] f32."""
    w1, b1, w2, b2, w3, b3 = params
    B, res_size = feat.shape
    ngh = w1.shape[1]
    att_size = w3.shape[1]

    # Lane/sublane alignment (the test shapes below already satisfy this).
    assert B % tile_m == 0 and tile_m % 8 == 0
    assert res_size % 128 == 0 and ngh % 128 == 0 and att_size % 128 == 0

    grid_m = pl.cdiv(B, tile_m)

    # Weights / biases are resident: index_map always returns block (0, 0),
    # so they are DMA'd once and reused for every batch tile.
    resident = lambda a: pl.BlockSpec(a.shape, lambda i: (0, 0))

    flops = 2 * B * (res_size * ngh + ngh * ngh + ngh * att_size)
    bytes_accessed = (
        feat.size * feat.dtype.itemsize
        + sum(a.size * a.dtype.itemsize for a in (w1, b1, w2, b2, w3, b3))
        + B * att_size * 4)

    return pl.pallas_call(
        dec_kernel,
        out_shape=jax.ShapeDtypeStruct((B, att_size), jnp.float32),
        grid_spec=pltpu.PrefetchScalarGridSpec(
            num_scalar_prefetch=0,
            grid=(grid_m,),
            in_specs=[
                pl.BlockSpec((tile_m, res_size), lambda i: (i, 0)),  # feat tile
                resident(w1), resident(b1),
                resident(w2), resident(b2),
                resident(w3), resident(b3),
            ],
            out_specs=pl.BlockSpec((tile_m, att_size), lambda i: (i, 0)),
            scratch_shapes=[pltpu.VMEM((tile_m, ngh), jnp.float32)],
        ),
        compiler_params=pltpu.CompilerParams(
            dimension_semantics=("parallel",),      # shards across v7x's 2 TCs
            vmem_limit_bytes=48 * 1024 * 1024,      # headroom for double buffers
        ),
        cost_estimate=pl.CostEstimate(
            flops=flops, transcendentals=0, bytes_accessed=bytes_accessed),
    )(feat, w1, b1, w2, b2, w3, b3)


def init_params(key, res_size, ngh, att_size):
    """Mimics weights_init: Linear.weight ~ N(0, 0.02), bias = 0.

    Weights are stored [in, out] and cast to bf16 (MXU-native); biases f32.
    """
    k1, k2, k3 = jax.random.split(key, 3)
    w1 = (0.02 * jax.random.normal(k1, (res_size, ngh), jnp.float32)
          ).astype(jnp.bfloat16)
    b1 = jnp.zeros((1, ngh), jnp.float32)
    w2 = (0.02 * jax.random.normal(k2, (ngh, ngh), jnp.float32)
          ).astype(jnp.bfloat16)
    b2 = jnp.zeros((1, ngh), jnp.float32)
    w3 = (0.02 * jax.random.normal(k3, (ngh, att_size), jnp.float32)
          ).astype(jnp.bfloat16)
    b3 = jnp.zeros((1, att_size), jnp.float32)
    return (w1, b1, w2, b2, w3, b3)


def reference_forward(feat, params):
    """Pure-JAX reference with the same bf16-operand / f32-accumulate scheme."""
    w1, b1, w2, b2, w3, b3 = params
    h = jnp.dot(feat.astype(jnp.bfloat16), w1,
                preferred_element_type=jnp.float32) + b1
    h = jnp.where(h > 0, h, 0.2 * h)
    h = jnp.dot(h.astype(jnp.bfloat16), w2,
                preferred_element_type=jnp.float32) + b2
    h = jnp.where(h > 0, h, 0.2 * h)
    h = jnp.dot(h.astype(jnp.bfloat16), w3,
                preferred_element_type=jnp.float32) + b3
    return h


if __name__ == "__main__":
    # Small but lane-dense shapes consistent with Dec:
    # opt.resSize=256, opt.ngh=128, opt.attSize=128, batch=16, TILE_M=8 (grid=2).
    RES, NGH, ATT, B, TILE_M = 256, 128, 128, 16, 8

    key = jax.random.PRNGKey(0)
    kp, kf = jax.random.split(key)

    params = init_params(kp, RES, NGH, ATT)
    feat = jax.random.normal(kf, (B, RES), jnp.float32)

    out = dec_forward(feat, params, tile_m=TILE_M)
    out = jax.block_until_ready(out)

    ref = reference_forward(feat, params)
    assert out.shape == (B, ATT)
    assert jnp.allclose(out, ref, atol=1e-2, rtol=1e-2), (
        float(jnp.max(jnp.abs(out - ref))))

    print("KERNEL_OK")
</pallas_src>

<mosaic_0001>
module attributes {stable_mosaic.version = 11 : i64} {
  func.func @dec_kernel(%arg0: i32, %arg1: memref<8x256xf32, #tpu.memory_space<vmem>>, %arg2: memref<256x128xbf16, #tpu.memory_space<vmem>>, %arg3: memref<1x128xf32, #tpu.memory_space<vmem>>, %arg4: memref<128x128xbf16, #tpu.memory_space<vmem>>, %arg5: memref<1x128xf32, #tpu.memory_space<vmem>>, %arg6: memref<128x128xbf16, #tpu.memory_space<vmem>>, %arg7: memref<1x128xf32, #tpu.memory_space<vmem>>, %arg8: memref<8x128xf32, #tpu.memory_space<vmem>>, %arg9: memref<8x128xf32, #tpu.memory_space<vmem>>) attributes {dimension_semantics = [#tpu.dimension_semantics<parallel>], iteration_bounds = array<i64: 2>, scalar_prefetch = 0 : i64, scratch_operands = 1 : i64, tpu.core_type = #tpu.core_type<tc>, window_params = [{transform_indices = @transform_0, window_bounds = array<i64: 8, 256>}, {pipeline_mode = #tpu.pipeline_mode<synchronous>, transform_indices = @transform_1, window_bounds = array<i64: 256, 128>}, {pipeline_mode = #tpu.pipeline_mode<synchronous>, transform_indices = @transform_2, window_bounds = array<i64: 1, 128>}, {pipeline_mode = #tpu.pipeline_mode<synchronous>, transform_indices = @transform_3, window_bounds = array<i64: 128, 128>}, {pipeline_mode = #tpu.pipeline_mode<synchronous>, transform_indices = @transform_4, window_bounds = array<i64: 1, 128>}, {pipeline_mode = #tpu.pipeline_mode<synchronous>, transform_indices = @transform_5, window_bounds = array<i64: 128, 128>}, {pipeline_mode = #tpu.pipeline_mode<synchronous>, transform_indices = @transform_6, window_bounds = array<i64: 1, 128>}, {transform_indices = @transform_7, window_bounds = array<i64: 8, 128>}]} {
    %c0 = arith.constant 0 : index
    %c0_0 = arith.constant 0 : index
    %0 = vector.load %arg1[%c0, %c0_0] : memref<8x256xf32, #tpu.memory_space<vmem>>, vector<8x256xf32>
    %1 = arith.truncf %0 : vector<8x256xf32> to vector<8x256xbf16>
    %c0_1 = arith.constant 0 : index
    %c0_2 = arith.constant 0 : index
    %2 = vector.load %arg2[%c0_1, %c0_2] : memref<256x128xbf16, #tpu.memory_space<vmem>>, vector<256x128xbf16>
    %cst = arith.constant dense<0.000000e+00> : vector<8x128xf32>
    %3 = tpu.matmul %1, %2, %cst {dimension_numbers = #tpu.dot_dimension_numbers<[1], [0], [0], [1], [0, 0, 1, 1], [], []>} : vector<8x256xbf16>, vector<256x128xbf16>, vector<8x128xf32> -> vector<8x128xf32>
    %c0_3 = arith.constant 0 : index
    %c0_4 = arith.constant 0 : index
    %4 = vector.load %arg3[%c0_3, %c0_4] : memref<1x128xf32, #tpu.memory_space<vmem>>, vector<1x128xf32>
    %5 = vector.broadcast %4 : vector<1x128xf32> to vector<8x128xf32>
    %6 = arith.addf %3, %5 : vector<8x128xf32>
    %cst_5 = arith.constant 0.000000e+00 : f32
    %7 = vector.broadcast %cst_5 : f32 to vector<8x128xf32>
    %8 = arith.cmpf ogt, %6, %7 : vector<8x128xf32>
    %cst_6 = arith.constant 2.000000e-01 : f32
    %9 = vector.broadcast %cst_6 : f32 to vector<8x128xf32>
    %10 = arith.mulf %9, %6 : vector<8x128xf32>
    %11 = arith.select %8, %6, %10 : vector<8x128xi1>, vector<8x128xf32>
    %c0_7 = arith.constant 0 : index
    %c0_8 = arith.constant 0 : index
    %12 = vector.load %arg9[%c0_7, %c0_8] : memref<8x128xf32, #tpu.memory_space<vmem>>, vector<8x128xf32>
    tpu.vector_store %arg9[%c0_7, %c0_8], %11 {strides = array<i32>} : memref<8x128xf32, #tpu.memory_space<vmem>>, vector<8x128xf32>,
    %c0_9 = arith.constant 0 : index
    %c0_10 = arith.constant 0 : index
    %13 = vector.load %arg9[%c0_9, %c0_10] : memref<8x128xf32, #tpu.memory_space<vmem>>, vector<8x128xf32>
    %14 = arith.truncf %13 : vector<8x128xf32> to vector<8x128xbf16>
    %c0_11 = arith.constant 0 : index
    %c0_12 = arith.constant 0 : index
    %15 = vector.load %arg4[%c0_11, %c0_12] : memref<128x128xbf16, #tpu.memory_space<vmem>>, vector<128x128xbf16>
    %cst_13 = arith.constant dense<0.000000e+00> : vector<8x128xf32>
    %16 = tpu.matmul %14, %15, %cst_13 {dimension_numbers = #tpu.dot_dimension_numbers<[1], [0], [0], [1], [0, 0, 1, 1], [], []>} : vector<8x128xbf16>, vector<128x128xbf16>, vector<8x128xf32> -> vector<8x128xf32>
    %c0_14 = arith.constant 0 : index
    %c0_15 = arith.constant 0 : index
    %17 = vector.load %arg5[%c0_14, %c0_15] : memref<1x128xf32, #tpu.memory_space<vmem>>, vector<1x128xf32>
    %18 = vector.broadcast %17 : vector<1x128xf32> to vector<8x128xf32>
    %19 = arith.addf %16, %18 : vector<8x128xf32>
    %cst_16 = arith.constant 0.000000e+00 : f32
    %20 = vector.broadcast %cst_16 : f32 to vector<8x128xf32>
    %21 = arith.cmpf ogt, %19, %20 : vector<8x128xf32>
    %cst_17 = arith.constant 2.000000e-01 : f32
    %22 = vector.broadcast %cst_17 : f32 to vector<8x128xf32>
    %23 = arith.mulf %22, %19 : vector<8x128xf32>
    %24 = arith.select %21, %19, %23 : vector<8x128xi1>, vector<8x128xf32>
    %c0_18 = arith.constant 0 : index
    %c0_19 = arith.constant 0 : index
    %25 = vector.load %arg9[%c0_18, %c0_19] : memref<8x128xf32, #tpu.memory_space<vmem>>, vector<8x128xf32>
    tpu.vector_store %arg9[%c0_18, %c0_19], %24 {strides = array<i32>} : memref<8x128xf32, #tpu.memory_space<vmem>>, vector<8x128xf32>,
    %c0_20 = arith.constant 0 : index
    %c0_21 = arith.constant 0 : index
    %26 = vector.load %arg9[%c0_20, %c0_21] : memref<8x128xf32, #tpu.memory_space<vmem>>, vector<8x128xf32>
    %27 = arith.truncf %26 : vector<8x128xf32> to vector<8x128xbf16>
    %c0_22 = arith.constant 0 : index
    %c0_23 = arith.constant 0 : index
    %28 = vector.load %arg6[%c0_22, %c0_23] : memref<128x128xbf16, #tpu.memory_space<vmem>>, vector<128x128xbf16>
    %cst_24 = arith.constant dense<0.000000e+00> : vector<8x128xf32>
    %29 = tpu.matmul %27, %28, %cst_24 {dimension_numbers = #tpu.dot_dimension_numbers<[1], [0], [0], [1], [0, 0, 1, 1], [], []>} : vector<8x128xbf16>, vector<128x128xbf16>, vector<8x128xf32> -> vector<8x128xf32>
    %c0_25 = arith.constant 0 : index
    %c0_26 = arith.constant 0 : index
    %30 = vector.load %arg7[%c0_25, %c0_26] : memref<1x128xf32, #tpu.memory_space<vmem>>, vector<1x128xf32>
    %31 = vector.broadcast %30 : vector<1x128xf32> to vector<8x128xf32>
    %32 = arith.addf %29, %31 : vector<8x128xf32>
    %c0_27 = arith.constant 0 : index
    %c0_28 = arith.constant 0 : index
    %33 = vector.load %arg8[%c0_27, %c0_28] : memref<8x128xf32, #tpu.memory_space<vmem>>, vector<8x128xf32>
    tpu.vector_store %arg8[%c0_27, %c0_28], %32 {strides = array<i32>} : memref<8x128xf32, #tpu.memory_space<vmem>>, vector<8x128xf32>,
    return
  }
  func.func @transform_0(%arg0: i32) -> (i32, i32) {
    %c0_i32 = arith.constant 0 : i32
    %c0_i32_0 = arith.constant 0 : i32
    return %arg0, %c0_i32 : i32, i32
  }
  func.func @transform_1(%arg0: i32) -> (i32, i32) {
    %c0_i32 = arith.constant 0 : i32
    %c0_i32_0 = arith.constant 0 : i32
    %c0_i32_1 = arith.constant 0 : i32
    return %c0_i32, %c0_i32_0 : i32, i32
  }
  func.func @transform_2(%arg0: i32) -> (i32, i32) {
    %c0_i32 = arith.constant 0 : i32
    %c0_i32_0 = arith.constant 0 : i32
    %c0_i32_1 = arith.constant 0 : i32
    return %c0_i32, %c0_i32_0 : i32, i32
  }
  func.func @transform_3(%arg0: i32) -> (i32, i32) {
    %c0_i32 = arith.constant 0 : i32
    %c0_i32_0 = arith.constant 0 : i32
    %c0_i32_1 = arith.constant 0 : i32
    return %c0_i32, %c0_i32_0 : i32, i32
  }
  func.func @transform_4(%arg0: i32) -> (i32, i32) {
    %c0_i32 = arith.constant 0 : i32
    %c0_i32_0 = arith.constant 0 : i32
    %c0_i32_1 = arith.constant 0 : i32
    return %c0_i32, %c0_i32_0 : i32, i32
  }
  func.func @transform_5(%arg0: i32) -> (i32, i32) {
    %c0_i32 = arith.constant 0 : i32
    %c0_i32_0 = arith.constant 0 : i32
    %c0_i32_1 = arith.constant 0 : i32
    return %c0_i32, %c0_i32_0 : i32, i32
  }
  func.func @transform_6(%arg0: i32) -> (i32, i32) {
    %c0_i32 = arith.constant 0 : i32
    %c0_i32_0 = arith.constant 0 : i32
    %c0_i32_1 = arith.constant 0 : i32
    return %c0_i32, %c0_i32_0 : i32, i32
  }
  func.func @transform_7(%arg0: i32) -> (i32, i32) {
    %c0_i32 = arith.constant 0 : i32
    %c0_i32_0 = arith.constant 0 : i32
    return %arg0, %c0_i32 : i32, i32
  }
}

</mosaic_0001>

<bundles_post_ra>
// kernel: dec_forward.1
= control target key start
LH: loop header
LB: loop body
LE: loop exit
PB: predicated region body
PF: predicated region fallthrough
CT: control target
= control target key end

     0   :  { %s1565_s0 = inlined_call_operand.hbm [shape: f32[16,256], index: 0, kind: input, shape index: {}]   ;;  %s1566_s1 = inlined_call_operand.hbm [shape: bf16[256,128], index: 1, kind: input, shape index: {}]   ;;  %s1567_s2 = inlined_call_operand.vmem [shape: f32[1,128], index: 2, kind: input, shape index: {}]   ;;  %s1568_s3 = inlined_call_operand.hbm [shape: bf16[128,128], index: 3, kind: input, shape index: {}]   ;;  %s1569_s4 = inlined_call_operand.vmem [shape: f32[1,128], index: 4, kind: input, shape index: {}]   ;;  %s1570_s5 = inlined_call_operand.hbm [shape: bf16[128,128], index: 5, kind: input, shape index: {}]   ;;  %s1571_s6 = inlined_call_operand.vmem [shape: f32[1,128], index: 6, kind: input, shape index: {}]   ;;  %s1572_s7 = inlined_call_operand.hbm [shape: f32[16,128], index: 7, kind: output, shape index: {}]  }
   0x1   :  { %1577 = sst [smem:[#allocation16_spill]] %s1566_s1 }
   0x2   :  { %1578 = sst [smem:[#allocation17_spill]] %s1568_s3 }
   0x3   :  { %12 = vsyncpa [#allocation4], 0 }
   0x4   :  { %14 = vsyncpa [#allocation4 + $0x1], 0 }
   0x5   :  { %15 = vsyncpa [#allocation7], 0 }
   0x6   :  { %16 = vsyncpa [#allocation10], 0 }
   0x7   :  { %17 = vsyncpa [#allocation5], 0 }
   0x8   :  { %19 = vsyncpa [#allocation5 + $0x1], 0  ;;  %s1344_s24 = smov 0   ;;  %s1346_s25 = smov 0  }
   0x9   :  { %s1348_s26 = smov 0   ;;  %s1350_s27 = smov 0  }
   0xa LB: > { %s1365_s28 = sadd.s32 4294967295, %s1293_s27   ;;  %s867_s29 = sadd.s32 4294967294, %s1293_s27   ;;  %s1293_s27 = sphi %s1350_s27, %s1600_s27   ;;  %s1289_s26 = sphi %s1348_s26, %s1599_s26   ;;  %s1285_s25 = sphi %s1346_s25, %s1598_s25   ;;  %s1281_s24 = sphi %s1344_s24, %s1597_s24  }
   0xb   : > { %p45_p0 = scmp.ne.s32.totalorder %s1285_s25, %s1281_s24  ;;  %p1573_p1 = scmp.eq.s32.totalorder %s1365_s28, 0 }
   0xc   : > { %p201_p3 = scmp.eq.s32.totalorder %s867_s29, 1  ;;  %p868_p5 = scmp.ge.s32.totalorder %s1293_s27, 1 }
   0xd   : > { %p1374_p4 = por %p1573_p1, %p45_p0  ;;  %p208_p7 = scmp.lt.s32.totalorder %s1293_s27, 3 }
   0xe   : > { %p1379_p6 = por %p201_p3, %p45_p0  ;;  %s1295_s10 = smov [#allocation6]  }
   0xf   : > { %s1579_s30 = scalar_select %p1374_p4, 1, 0 }
  0x10   : > { %s1580_s8 = scalar_select %p1379_p6, 1, 0 }
  0x11   : > { %p1384_p8 = pnand %p868_p5, %p208_p7  ;;  %s220_s11 = sshll.u32 %s1295_s10, 4  ;;  %s221_s11 = int_to_ptr.vmem [resolvable:$true] %s220_s11 }
  0x12   : > { %s1296_s13 = smov [#allocation8]   ;;  %s1297_s15 = smov [#allocation9]  }
  0x13   : > { %s1581_s9 = scalar_select %p1384_p8, 1, 0 }
  0x14   : > { %p1018_p9 = pneg %p1384_p8  ;;  %s236_s14 = sshll.u32 %s1296_s13, 4  ;;  %s237_s14 = int_to_ptr.vmem [resolvable:$true] %s236_s14 }
  0x15   : > { %s252_s16 = sshll.u32 %s1297_s15, 4  ;;  %s1126_s17 = scalar_lea.vmem %s221_s11, 2048  ;;  %s253_s16 = int_to_ptr.vmem [resolvable:$true] %s252_s16 }
  0x16   : > { %p1393_p11 = pnand %p1018_p9, %p1573_p1  ;;  %p1127_p13 = scmp.ne.s32.totalorder %s221_s11, %s1126_s17 }
  0x17   : > { %p1134_p5 = scmp.lt.s32.totalorder %s221_s11, %s221_s11  ;;  %p1135_p7 = scmp.lt.s32.totalorder %s1126_s17, %s1126_s17 }
  0x18   : > { %p1117_p12 = pneg %p1393_p11 }
  0x19   : > { %p1136_p9 = por %p1135_p7, %p1134_p5 }
  0x1a   : > { %p1129_p0 = pnand %p1127_p13, %p1117_p12 }
  0x1c   : > { %p1130_p3 = pneg %p1129_p0 }
  0x1e   : > { %p1137_p10 = pnand %p1136_p9, %p1130_p3 }
  0x20   : > { %1140 = shalt.err (!%p1137_p10)
}
  0x21   : > { %s1298_s18 = smov 64   ;;  %s1299_s19 = smov 4  }
  0x22   : > { %s1583_s1 = sld [smem:[#allocation16_spill]]  ;;  %s1152_s22 = scalar_lea.vmem %s237_s14, 1024 }
  0x23   : > { %p1153_p1 = scmp.ne.s32.totalorder %s237_s14, %s1152_s22  ;;  %p1160_p2 = scmp.lt.s32.totalorder %s237_s14, %s237_s14 }
  0x24   : > { %p1161_p6 = scmp.lt.s32.totalorder %s1152_s22, %s1152_s22 }
  0x25   : > { %p1155_p13 = pnand %p1153_p1, %p1117_p12 }
  0x26   : > { %p1162_p5 = por %p1161_p6, %p1160_p2 }
  0x27   : > { %p1156_p0 = pneg %p1155_p13 }
  0x28   : > { %1021 = dma.hbm_to_vmem [thread:$0]  (!%p1393_p11), %s1583_s1, 2048, %s221_s11, [#allocation7], %s1298_s18, %s1298_s18, %s1299_s19  }
  0x29   : > { %p1163_p3 = pnand %p1162_p5, %p1156_p0 }
  0x2b   : > { %1166 = shalt.err (!%p1163_p3)
}
  0x2c   : > { %s1584_s3 = sld [smem:[#allocation17_spill]]  ;;  %s1178_s10 = scalar_lea.vmem %s253_s16, 1024 }
  0x2d   : > { %p1179_p10 = scmp.ne.s32.totalorder %s253_s16, %s1178_s10  ;;  %p1186_p9 = scmp.lt.s32.totalorder %s253_s16, %s253_s16 }
  0x2e   : > { %p1187_p13 = scmp.lt.s32.totalorder %s1178_s10, %s1178_s10 }
  0x2f   : > { %p1181_p7 = pnand %p1179_p10, %p1117_p12 }
  0x30   : > { %p1188_p4 = por %p1187_p13, %p1186_p9 }
  0x31   : > { %p1182_p1 = pneg %p1181_p7 }
  0x32   : > { %1024 = dma.hbm_to_vmem [thread:$0]  (!%p1393_p11), %s1584_s3, 1024, %s237_s14, [#allocation7], %s1298_s18, %s1298_s18, %s1299_s19  }
  0x33   : > { %p1189_p2 = pnand %p1188_p4, %p1182_p1 }
  0x35   : > { %1192 = shalt.err (!%p1189_p2)
}
  0x36   : > { %1027 = dma.hbm_to_vmem [thread:$0]  (!%p1393_p11), %s1570_s5, 1024, %s253_s16, [#allocation10], %s1298_s18, %s1298_s18, %s1299_s19  }
  0x37   : > { %s1424_s14 = sadd.s32 1, %s1293_s27   ;;  %s32_s12 = sadd.s32 1, %s1289_s26 }
  0x38   : > { %s29_s15 = ssub.s32 %s1293_s27, %s1424_s14  ;;  %p39_p6 = scmp.ne.s32.totalorder %s1289_s26, %s1285_s25 }
  0x39   : > { %p30_p4 = scmp.eq.s32.totalorder %s29_s15, 0  ;;  %p40_p12 = scmp.eq.s32.totalorder %s1293_s27, 0 }
  0x3a   : > { %p1039_p0 = scmp.lt.s32.totalorder %s1293_s27, 2  ;;  %p1585_p3 = scmp.eq.s32.totalorder %s1365_s28, 1 }
  0x3b   : > { %s1434_s17 = scalar_select %p30_p4, %s1289_s26, %s32_s12  }
  0x3c   : > { %p41_p5 = por %p40_p12, %p39_p6  ;;  %p1438_p10 = por %p1585_p3, %p39_p6 }
  0x3d   : > { %s269_s21 = sand.u32 1, %s1289_s26   ;;  %s921_s22 = sshll.u32 %s1293_s27, 8 }
  0x3e   : > { %s1586_s20 = scalar_select %p1438_p10, 1, 0 }
  0x3f   : > { %s873_s16 = sshll.u32 %s269_s21, 4  ;;  %s1447_s23 = scalar_lea.hbm %s1565_s0, %s921_s22 }
  0x40   : > { %s273_s29 = scalar_lea.vmem [#allocation3], %s873_s16  ;;  %p1449_p11 = pnand %p1039_p0, %p41_p5 }
  0x41   : > { %s281_s10 = sshll.u32 %s273_s29, 4  ;;  %s270_s13 = scalar_lea.sflag [#allocation4], %s269_s21  ;;  %s282_s10 = int_to_ptr.vmem [resolvable:$true] %s281_s10 }
  0x42   : > { %s1193_s15 = scalar_lea.hbm %s1447_s23, 256  ;;  %p1195_p1 = pneg %p1449_p11 }
  0x43   : > { %p1194_p7 = scmp.ne.s32.totalorder %s1447_s23, %s1193_s15  ;;  %s1198_s18 = scalar_lea.hbm %s1565_s0, 512 }
  0x44   : > { %p1199_p2 = scmp.lt.s32.totalorder %s1447_s23, %s1565_s0  ;;  %p1200_p4 = scmp.lt.s32.totalorder %s1198_s18, %s1193_s15 }
  0x45   : > { %p1196_p9 = pnand %p1195_p1, %p1194_p7 }
  0x46   : > { %p1201_p6 = por %p1200_p4, %p1199_p2 }
  0x47   : > { %p1197_p13 = pneg %p1196_p9 }
  0x49   : > { %p1202_p12 = pnand %p1201_p6, %p1197_p13 }
  0x4b   : > { %1205 = shalt.err (!%p1202_p12)
}
  0x4c   : > { %s1206_s29 = scalar_lea.vmem %s282_s10, 256  ;;  %s1300_s21 = smov [#allocation3]  }
  0x4d   : > { %p1207_p0 = scmp.ne.s32.totalorder %s282_s10, %s1206_s29  ;;  %s1211_s1 = sshll.u32 %s1300_s21, 4  ;;  %s1212_s1 = int_to_ptr.vmem [resolvable:$false] %s1211_s1 }
  0x4e   : > { %s1213_s3 = scalar_lea.vmem %s1212_s1, 512  ;;  %p1214_p7 = scmp.lt.s32.totalorder %s282_s10, %s1212_s1 }
  0x4f   : > { %p1209_p5 = pnand %p1207_p0, %p1195_p1  ;;  %p1215_p9 = scmp.lt.s32.totalorder %s1213_s3, %s1206_s29 }
  0x51   : > { %p1210_p3 = pneg %p1209_p5  ;;  %p1216_p10 = por %p1215_p9, %p1214_p7 }
  0x53   : > { %p1217_p8 = pnand %p1216_p10, %p1210_p3 }
  0x55   : > { %1220 = shalt.err (!%p1217_p8)
}
  0x56   : > { %1031 = dma.hbm_to_vmem [thread:$0]  (!%p1449_p11), %s1447_s23, 256, %s282_s10, %s270_s13  }
  0x57   : > { %p1588_p13 = scmp.ne.s32.totalorder %s1581_s9, 0 }
  0x58   : > { %s1470_s15 = sand.u32 (!%p1588_p13), 1, %s1285_s25   ;;  %p1589_p1 = scmp.ne.s32.totalorder (!%p1588_p13), %s1579_s30, 0 }
  0x59   : > { %290 = sbr.rel (%p1588_p13) target bundleno = 747 (0x2eb), region = 48  ;;  %s877_s12 = sshll.u32 (!%p1588_p13), %s1470_s15, 4 }
  0x5a   : > { %s293_s22 = scalar_lea.sflag (!%p1588_p13), [#allocation4], %s1470_s15  ;;  %s1474_s1 = scalar_lea.vmem (!%p1588_p13), [#allocation3], %s877_s12 }
  0x5e   : > { %1264 = dma.done.wait (%p1589_p1), %s293_s22, 256  }
  0x5f   : > { %1266 = vsyncadd (%p1589_p1), %s293_s22, 4294967040  ;;  %p1590_p8 = scmp.eq.s32.totalorder %s1365_s28, 0 }
  0x61   : > { %1268 = dma.done.wait (%p1590_p8), [#allocation7], 3072   ;;  %p1591_p10 = pmov %p1590_p8 }
  0x62   : > { %p1592_p11 = pmov %p1590_p8 }
  0x63   : > { %1270 = vsyncadd (%p1591_p10), [#allocation7], 4294964224 }
  0x64   : > { %1272 = dma.done.wait (%p1592_p11), [#allocation10], 1024   ;;  %p1593_p2 = pmov %p1590_p8 }
  0x65   : > { %v1301_v0 = vmov 0.0   ;;  %v1083_v1 = vld [vmem:[#allocation6 + $0x78] sm:$0xff]   ;;  %v1085_v3 = vld [vmem:[#allocation6 + $0x70] sm:$0xff]   ;;  %v1087_v5 = vld [vmem:[#allocation6 + $0x68] sm:$0xff]   ;;  %vm1302_vm0 = vmmov 0   ;;  %s881_s10 = sshll.u32 %s1470_s15, 3 }
  0x66   : > { %1274 = vsyncadd (%p1593_p2), [#allocation10], 4294966272  ;;  %962 = vmatprep.subr.bf16.mxu1 %v1301_v0  ;;  %v1084_v2 = vld [vmem:[#allocation6 + $0x38] sm:$0xff]   ;;  %922 = vmatprep.subr.bf16.mxu0 %v1083_v1  ;;  %v1086_v4 = vld [vmem:[#allocation6 + $0x30] sm:$0xff]   ;;  %s918_s18 = sshll.u32 %s1365_s28, 7  ;;  %s338_s19 = scalar_lea.vmem [#allocation11], %s881_s10 }
  0x67   : > { %923 = vmatpush3.bf16.msra.mxu0 %v1084_v2  ;;  %v1088_v6 = vld [vmem:[#allocation6 + $0x28] sm:$0xff]   ;;  %v1089_v7 = vld [vmem:[#allocation6 + $0x60] sm:$0xff]   ;;  %v1091_v9 = vld [vmem:[#allocation6 + $0x58] sm:$0xff]   ;;  %978 = vmatprep.mubr.msk.bf16.mxu1 %vm1302_vm0, %v1301_v0  ;;  %s768_s16 = sshll.u32 %s338_s19, 4  ;;  %s1522_s12 = scalar_lea.hbm %s1572_s7, %s918_s18  ;;  %s1524_s16 = int_to_ptr.vmem [resolvable:$true] %s768_s16 }
  0x68   : > { %924 = vmatprep.subr.bf16.mxu0 %v1085_v3  ;;  %v1090_v8 = vld [vmem:[#allocation6 + $0x20] sm:$0xff]   ;;  %v1092_v10 = vld [vmem:[#allocation6 + $0x18] sm:$0xff]   ;;  %v1093_v11 = vld [vmem:[#allocation6 + $0x50] sm:$0xff]   ;;  %s755_s22 = scalar_lea.sflag [#allocation5], %s1470_s15  ;;  %p1594_p6 = scmp.ne.s32.totalorder %s1586_s20, 0 }
  0x69   : > { %v341_v12 = vld [vmem:[%s1474_s1 + $0x8] sm:$0xff]  ;;  %v1094_v15 = vld [vmem:[#allocation6 + $0x10] sm:$0xff]   ;;  %v1097_v19 = vld [vmem:[#allocation6 + $0x40] sm:$0xff]   ;;  %s1303_s28 = smov [#allocation11]  }
  0x6a   : > { %v343_v13 = vpack.c.bf16 %v341_v12, %v341_v12  ;;  %v1099_v14 = vld [vmem:[#allocation8 + $0x38] sm:$0xff]   ;;  %v1095_v16 = vld [vmem:[#allocation6 + $0x48] sm:$0xff]   ;;  %v1100_v17 = vld [vmem:[#allocation8 + $0x30] sm:$0xff]   ;;  %s1225_s3 = sshll.u32 %s1303_s28, 4  ;;  %s1226_s3 = int_to_ptr.vmem [resolvable:$false] %s1225_s3 }
  0x6b   : > { %925 = vmatpush3.bf16.msra.mxu0 %v1086_v4  ;;  %963 = vmatpush3.bf16.msra.mxu1 %v1099_v14  ;;  %v1096_v18 = vld [vmem:[#allocation6 + $0x8] sm:$0xff]   ;;  %v1098_v21 = vld [vmem:[#allocation6] sm:$0xff]   ;;  %v1103_v25 = vld [vmem:[#allocation8 + $0x18] sm:$0xff]   ;;  %s1227_s30 = scalar_lea.vmem %s1226_s3, 256  ;;  %p1228_p5 = scmp.lt.s32.totalorder %s1524_s16, %s1226_s3 }
  0x6c   : > { %926 = vmatprep.subr.bf16.mxu0 %v1087_v5  ;;  %511 = vmatprep.mubr.bf16.mxu0 %v343_v13  ;;  %v1101_v20 = vld [vmem:[#allocation8 + $0x28] sm:$0xff]   ;;  %v340_v22 = vld [vmem:[%s1474_s1] sm:$0xff]  ;;  %v1107_v29 = vld [vmem:[#allocation9 + $0x38] sm:$0xff]   ;;  %s1221_s1 = scalar_lea.vmem %s1524_s16, 128 }
  0x6d   : > { %964 = vmatprep.subr.bf16.mxu1 %v1301_v0  ;;  %v1102_v23 = vld [vmem:[#allocation8 + $0x20] sm:$0xff]   ;;  %v342_v24 = vpack.c.bf16 %v340_v22, %v340_v22  ;;  %v1104_v26 = vld [vmem:[#allocation8 + $0x10] sm:$0xff]   ;;  %v1105_v27 = vld [vmem:[#allocation8 + $0x8] sm:$0xff]   ;;  %p1222_p4 = scmp.ne.s32.totalorder %s1524_s16, %s1221_s1  ;;  %p1229_p3 = scmp.lt.s32.totalorder %s1227_s30, %s1221_s1 }
  0x6e   : > { %v1106_v28 = vld [vmem:[#allocation8] sm:$0xff]   ;;  %v1108_v30 = vld [vmem:[#allocation9 + $0x30] sm:$0xff]   ;;  %v1109_v31 = vld [vmem:[#allocation9 + $0x28] sm:$0xff]  }
  0x6f   : > { %927 = vmatpush3.bf16.msra.mxu0 %v1088_v6  ;;  %965 = vmatpush3.bf16.msra.mxu1 %v1100_v17  ;;  %v1110_v32 = vld [vmem:[#allocation9 + $0x20] sm:$0xff]   ;;  %v1111_v33 = vld [vmem:[#allocation9 + $0x18] sm:$0xff]   ;;  %v1112_v34 = vld [vmem:[#allocation9 + $0x10] sm:$0xff]   ;;  %p1223_p12 = pnand %p1222_p4, %p1594_p6  ;;  %p1230_p7 = por %p1229_p3, %p1228_p5 }
  0x70   : > { %928 = vmatprep.subr.bf16.mxu0 %v1089_v7  ;;  %966 = vmatprep.subr.bf16.mxu1 %v1301_v0  ;;  %v882_v36 = vld [vmem:[%s1567_s2] ss:$0 sm:$0xff]  ;;  %v1113_v45 = vld [vmem:[#allocation9 + $0x8] sm:$0xff]  }
  0x71   : > { %v1114_v46 = vld [vmem:[#allocation9] sm:$0xff]   ;;  %p1224_p0 = pneg %p1223_p12 }
  0x72   : > { %v899_v47 = vld [vmem:[%s1569_s4] ss:$0 sm:$0xff] }
  0x73   : > { %929 = vmatpush3.bf16.msra.mxu0 %v1090_v8  ;;  %967 = vmatpush3.bf16.msra.mxu1 %v1101_v20  ;;  %v908_v56 = vld [vmem:[%s1571_s6] ss:$0 sm:$0xff]  ;;  %p1231_p9 = pnand %p1230_p7, %p1224_p0 }
  0x74   : > { %930 = vmatprep.subr.bf16.mxu0 %v1091_v9  ;;  %968 = vmatprep.subr.bf16.mxu1 %v1301_v0 }
  0x77   : > { %931 = vmatpush3.bf16.msra.mxu0 %v1092_v10  ;;  %969 = vmatpush3.bf16.msra.mxu1 %v1102_v23 }
  0x78   : > { %932 = vmatprep.subr.bf16.mxu0 %v1093_v11  ;;  %970 = vmatprep.subr.bf16.mxu1 %v1301_v0 }
  0x7b   : > { %933 = vmatpush3.bf16.msra.mxu0 %v1094_v15  ;;  %971 = vmatpush3.bf16.msra.mxu1 %v1103_v25 }
  0x7c   : > { %934 = vmatprep.subr.bf16.mxu0 %v1095_v16  ;;  %972 = vmatprep.subr.bf16.mxu1 %v1301_v0 }
  0x7f   : > { %935 = vmatpush3.bf16.msra.mxu0 %v1096_v18  ;;  %973 = vmatpush3.bf16.msra.mxu1 %v1104_v26 }
  0x80   : > { %936 = vmatprep.subr.bf16.mxu0 %v1097_v19  ;;  %974 = vmatprep.subr.bf16.mxu1 %v1301_v0 }
  0x83   : > { %937 = vmatpush3.bf16.msra.mxu0 %v1098_v21  ;;  %975 = vmatpush3.bf16.msra.mxu1 %v1105_v27 }
  0x84   : > { %982 = vmatprep.subr.bf16.mxu0 %v1301_v0  ;;  %976 = vmatprep.subr.bf16.mxu1 %v1301_v0 }
  0x86   : > { %512 = vmatmul.mubr.bf16.vlgmr.msra.gmra.mxu0 %v342_v24 }
  0x87   : > { %998 = vmatprep.mubr.msk.bf16.mxu0 %vm1302_vm0, %v1301_v0  ;;  %977 = vmatpush3.bf16.msra.mxu1 %v1106_v28 }
  0x88   : > { %983 = vmatpush3.bf16.msra.mxu0 %v1107_v29 }
  0x89   : > { %984 = vmatprep.subr.bf16.mxu0 %v1301_v0 }
  0x8c   : > { %985 = vmatpush3.bf16.msra.mxu0 %v1108_v30 }
  0x8d   : > { %986 = vmatprep.subr.bf16.mxu0 %v1301_v0 }
  0x90   : > { %987 = vmatpush3.bf16.msra.mxu0 %v1109_v31 }
  0x91   : > { %988 = vmatprep.subr.bf16.mxu0 %v1301_v0 }
  0x94   : > { %989 = vmatpush3.bf16.msra.mxu0 %v1110_v32 }
  0x95   : > { %990 = vmatprep.subr.bf16.mxu0 %v1301_v0 }
  0x98   : > { %991 = vmatpush3.bf16.msra.mxu0 %v1111_v33 }
  0x99   : > { %992 = vmatprep.subr.bf16.mxu0 %v1301_v0 }
  0x9c   : > { %993 = vmatpush3.bf16.msra.mxu0 %v1112_v34 }
  0x9d   : > { %994 = vmatprep.subr.bf16.mxu0 %v1301_v0 }
  0xa0   : > { %995 = vmatpush3.bf16.msra.mxu0 %v1113_v45 }
  0xa1   : > { %996 = vmatprep.subr.bf16.mxu0 %v1301_v0 }
  0xa4   : > { %997 = vmatpush3.bf16.msra.mxu0 %v1114_v46 }
 0x146   : > { %v938_v35 = vpop.f32.mrf.mxu0 }
 0x148   : > { %v939_v37 = vpop.f32.mrf.mxu0 }
 0x149   : > { %v940_v38 = vadd.f32 %v939_v37, %v938_v35 }
 0x14a   : > { %v941_v39 = vpop.f32.mrf.mxu0 }
 0x14b   : > { %v514_v40 = vadd.f32 %v940_v38, %v882_v36 }
 0x14c   : > { %v942_v41 = vpop.f32.mrf.mxu0 }
 0x14d   : > { %v520_v42 = vmul.f32 0.2, %v514_v40  ;;  %vm519_vm1 = vcmp.gt.f32.partialorder %v514_v40, 0.0 }
 0x14f   : > { %v521_v43 = vsel %vm519_vm1, %v514_v40, %v520_v42 }
 0x150   : > { %v524_v44 = vpack.c.bf16 %v521_v43, %v521_v43 }
 0x152   : > { %979 = vmatmul.mubr.bf16.vlgmr.msra.gmra.mxu1 %v524_v44 }
 0x212   : > { %v630_v48 = vpop.f32.mrf.mxu1 }
 0x213   : > { %v631_v49 = vadd.f32 %v899_v47, %v630_v48 }
 0x214   : > { %v980_v50 = vpop.f32.mrf.mxu1 }
 0x215   : > { %vm636_vm2 = vcmp.gt.f32.partialorder %v631_v49, 0.0  ;;  %v637_v51 = vmul.f32 0.2, %v631_v49 }
 0x216   : > { %v633_v52 = vpop.f32.mrf.mxu1 }
 0x217   : > { %v638_v53 = vsel %vm636_vm2, %v631_v49, %v637_v51 }
 0x218   : > { %v641_v54 = vpack.c.bf16 %v638_v53, %v638_v53  ;;  %v981_v55 = vpop.f32.mrf.mxu1 }
 0x21a   : > { %999 = vmatmul.mubr.bf16.vlgmr.msra.gmra.mxu0 %v641_v54 }
 0x2da   : > { %v747_v57 = vpop.f32.mrf.mxu0 }
 0x2db   : > { %v748_v58 = vadd.f32 %v908_v56, %v747_v57 }
 0x2dc   : > { %v1000_v59 = vpop.f32.mrf.mxu0 }
 0x2dd   : > { %753 = vst [vmem:[%s338_s19] sm:$0xff] %v748_v58 }
 0x2de   : > { %v750_v60 = vpop.f32.mrf.mxu0 }
 0x2df   : > { %1234 = shalt.err (!%p1231_p9)
}
 0x2e0   : > { %s1235_s9 = scalar_lea.hbm %s1522_s12, 128  ;;  %s1239_s10 = scalar_lea.hbm %s1572_s7, 256 }
 0x2e1   : > { %p1236_p13 = scmp.ne.s32.totalorder %s1522_s12, %s1235_s9  ;;  %p1240_p10 = scmp.lt.s32.totalorder %s1522_s12, %s1572_s7 }
 0x2e2   : > { %p1241_p11 = scmp.lt.s32.totalorder %s1239_s10, %s1235_s9 }
 0x2e3   : > { %p1237_p1 = pnand %p1236_p13, %p1594_p6 }
 0x2e4   : > { %p1242_p2 = por %p1241_p11, %p1240_p10 }
 0x2e5   : > { %p1238_p8 = pneg %p1237_p1 }
 0x2e7   : > { %p1243_p4 = pnand %p1242_p2, %p1238_p8 }
 0x2e9   : > { %1246 = shalt.err (!%p1243_p4)
}
 0x2ea   : > { %1016 = dma.vmem_to_hbm [thread:$0]  (%p1594_p6), %s1524_s16, 128, %s1522_s12, %s755_s22   ;;  %v1001_v61 = vpop.f32.mrf.mxu0 }
 0x2eb PF: > { %s780_s18 = sand.u32 1, %s1281_s24   ;;  %p1595_p12 = scmp.ne.s32.totalorder %s1580_s8, 0 }
 0x2ec   : > { %p1596_p0 = scmp.ge.s32.totalorder %s1293_s27, 2  ;;  %s781_s19 = scalar_lea.sflag [#allocation5], %s780_s18 }
 0x2ee   : > { %p1033_p5 = pnand %p1596_p0, %p1595_p12 }
 0x2f0   : > { %p1034_p3 = pneg %p1033_p5 }
 0x2f2   : > { %1276 = dma.done.wait (%p1034_p3), %s781_s19, 128  }
 0x2f3   : > { %1278 = vsyncadd (%p1034_p3), %s781_s19, 4294967168  ;;  %p22_p7 = scmp.ge.s32.totalorder %s1424_s14, 4   ;;  %s1597_s24 = smov %s1285_s25 }
 0x2f4   : > { %s1598_s25 = smov %s1289_s26  ;;  %s1599_s26 = smov %s1434_s17 }
 0x2f5   : > { %s1600_s27 = smov %s1424_s14  ;;  %24 = sbr.rel (!%p22_p7) target bundleno = 10 (0xa), region = 105 }
 0x2fa   :  { %786 = vsyncpa [#allocation4], 1 }
 0x2fb   :  { %788 = vsyncpa [#allocation4 + $0x1], 1 }
 0x2fc   :  { %789 = vsyncpa [#allocation7], 1 }
 0x2fd   :  { %790 = vsyncpa [#allocation10], 1 }
 0x2fe   :  { %791 = vsyncpa [#allocation5], 1 }
 0x2ff   :  { %793 = vsyncpa [#allocation5 + $0x1], 1 }

</bundles_post_ra>
